<compile_context>
chip_gen: v7x
topology: tpu7x:2x2x1
jax: 0.10.0
libtpu: 0.0.40
codegen_flags: <defaults>
</compile_context>

<pallas_src>
import functools

import jax
import jax.numpy as jnp
from jax import lax
from jax.experimental import pallas as pl
from jax.experimental.pallas import tpu as pltpu

STYLE_WEIGHING_SCHEMES = ["default", "improved", "recommended"]

_NUM_FILTERS = {
    5: [64, 128, 256, 512, 512],
    16: [64, 64, 128, 128, 256, 256, 256, 256,
         512, 512, 512, 512, 512, 512, 512, 512],
}


def _compute_weights(num_layers, weight_type="default", chained_gram=False):
    assert weight_type in STYLE_WEIGHING_SCHEMES, "Invalid weighing scheme passed"
    if weight_type in ["default", "improved"]:
        num_layers = num_layers - 1 if chained_gram else num_layers
        weights = ([1.0 for _ in range(num_layers)]
                   if weight_type == "default"
                   else [2 ** (num_layers - (i + 1)) for i in range(num_layers)])
    else:
        filters = (zip(_NUM_FILTERS[num_layers], _NUM_FILTERS[num_layers][1:])
                   if chained_gram
                   else zip(_NUM_FILTERS[num_layers], _NUM_FILTERS[num_layers]))
        weights = [1.0 / (f1 * f2) for f1, f2 in filters]
    return [w / sum(weights) for w in weights]


# ----------------------------------------------------------------------------
# VMEM budgeting & tile selection
# ----------------------------------------------------------------------------

def _vmem_budget_bytes():
    """~3/4 of physical VMEM per TensorCore: ~48 MiB on v7x (64 MiB physical),
    ~96 MiB on v5e/v6e (128 MiB).  Conservative default if the query fails."""
    cap = 64 << 20
    try:
        cap = int(pltpu.get_tpu_info().vmem_capacity_bytes)
    except Exception:
        pass
    return max((cap * 3) // 4, 32 << 20)


def _choose_lane_tile(spatial_len, channels, itemsize, vmem_budget):
    """Largest lane (H*W) tile that fits the VMEM budget; prefer a
    multiple-of-128 divisor of L so no masking/padding is ever needed."""
    fixed = 8 * channels * channels * 4 + (6 << 20)   # acc + temporaries + headroom
    avail = max(vmem_budget - fixed, 2 << 20)
    cap = avail // (2 * channels * itemsize)          # double-buffered streamed input
    cap = max(128, min((cap // 128) * 128, 32768))
    if spatial_len <= cap:
        return spatial_len                            # single full-extent block
    for mult in range(cap // 128, 0, -1):
        tile = 128 * mult
        if spatial_len % tile == 0:
            return tile                               # exact tiling, no ragged tail
    return cap                                        # ragged tail masked in-kernel


# ----------------------------------------------------------------------------
# Pallas gram kernel
# ----------------------------------------------------------------------------

def _make_gram_kernel(shift, lane_tile, spatial_len, n_tiles, tiles_per_split,
                      guard_dummy_tiles):
    """Streams (C, lane_tile) tiles of one feature map and accumulates the raw
    gram x @ x.T in f32 directly into the resident output block.

    All parameters are Python scalars baked in as literals (pallas_call rejects
    captured jax-array constants)."""
    shift = float(shift)
    ragged = (spatial_len % lane_tile) != 0
    contract = (((1,), (1,)), ((), ()))       # contract the lane (H*W) axis

    def kernel(x_ref, o_ref):
        split = pl.program_id(0)
        step = pl.program_id(2)
        tile = split * tiles_per_split + step

        @pl.when(step == 0)
        def _():
            o_ref[...] = jnp.zeros_like(o_ref)

        def accumulate():
            x = x_ref[0]                                   # (C, lane_tile), native dtype
            if shift != 0.0:                               # static Python branch
                x = x - shift
            if ragged:                                     # mask OOB lanes of last tile
                lane = lax.broadcasted_iota(jnp.int32, x.shape, 1)
                x = jnp.where(lane < spatial_len - tile * lane_tile, x, 0)
            if x.dtype != jnp.bfloat16:                    # bf16 MXU operands,
                x = x.astype(jnp.bfloat16)                 # f32 accumulation below
            g = lax.dot_general(x, x, dimension_numbers=contract,
                                preferred_element_type=jnp.float32)   # (C, C)
            o_ref[0, 0] += g

        if guard_dummy_tiles:                              # skip clamped tail tiles
            pl.when(tile < n_tiles)(accumulate)
        else:
            accumulate()

    return kernel


@functools.partial(jax.jit,
                   static_argnames=("shift", "lane_tile", "n_splits", "vmem_limit"))
def _normalized_gram_impl(x, *, shift, lane_tile, n_splits, vmem_limit):
    B, C, L = x.shape
    n_tiles = (L + lane_tile - 1) // lane_tile
    tiles_per_split = (n_tiles + n_splits - 1) // n_splits
    guard = tiles_per_split * n_splits > n_tiles           # dummy tail tiles exist

    kernel = _make_gram_kernel(shift, lane_tile, L, n_tiles, tiles_per_split, guard)

    def x_index(split, b, step):
        tile = split * tiles_per_split + step
        if guard:                         # clamp dummy tail tiles to a valid block
            tile = jnp.minimum(tile, n_tiles - 1)
        return (b, 0, tile)

    partials = pl.pallas_call(
        kernel,
        out_shape=jax.ShapeDtypeStruct((n_splits, B, C, C), jnp.float32),
        grid=(n_splits, B, tiles_per_split),
        in_specs=[pl.BlockSpec((1, C, lane_tile), x_index)],
        out_specs=pl.BlockSpec((1, 1, C, C), lambda s, b, l: (s, b, 0, 0)),
        compiler_params=pltpu.CompilerParams(
            dimension_semantics=("parallel", "parallel", "arbitrary"),
            vmem_limit_bytes=vmem_limit),
    )(x)
    # Tiny (C*C) epilogue, fused by XLA: combine core-split partials and fold in
    # the 1/(2*C*H*W) normalization.
    return jnp.sum(partials, axis=0) * (1.0 / float(2 * C * L))


def normalized_gram(x_nchw, activation_shift=0.0, *, lane_tile=None, lane_splits=None):
    """Normalized gram matrices of an NCHW feature map:
       out[b] = V @ V.T / (2*C*H*W)   with   V = (x[b] - shift).reshape(C, H*W)."""
    B, C, H, W = x_nchw.shape
    L = H * W
    x = x_nchw.reshape(B, C, L)                 # long spatial axis -> TPU lanes
    itemsize = jnp.dtype(x.dtype).itemsize
    budget = _vmem_budget_bytes()

    if lane_tile is None:
        lane_tile = _choose_lane_tile(L, C, itemsize, budget)
    lane_tile = int(min(lane_tile, L))
    assert lane_tile == L or lane_tile % 128 == 0, "lane_tile must be 128-aligned"
    n_tiles = (L + lane_tile - 1) // lane_tile

    # 2-way split of the contraction tiles across TensorCores when the batch
    # axis alone cannot keep a 2-TC chip (v7x) busy; harmless elsewhere since
    # the split axis is marked "parallel" (sequential on 1-TC chips).
    if lane_splits is None:
        lane_splits = 2 if (B == 1 and n_tiles >= 4) else 1
    n_splits = max(1, min(int(lane_splits), n_tiles))

    vmem_est = (2 * C * lane_tile * itemsize    # streamed input, double-buffered
                + C * lane_tile * 2             # in-kernel bf16 copy of the tile
                + 5 * C * C * 4                 # resident output acc + dot result
                + (4 << 20))                    # headroom
    vmem_limit = int(min(max(vmem_est, 32 << 20), budget))

    return _normalized_gram_impl(x, shift=float(activation_shift),
                                 lane_tile=lane_tile, n_splits=n_splits,
                                 vmem_limit=vmem_limit)


# ----------------------------------------------------------------------------
# StyleLoss module
# ----------------------------------------------------------------------------

class StyleLossPallas:
    """JAX/Pallas equivalent of pynache.models.losses.StyleLoss.

    All HBM-heavy work (streaming the feature maps + MXU contraction) happens
    in the Pallas gram kernel; the tiny gram-difference / squared-Frobenius
    epilogue on the (B, C, C) grams runs as plain XLA.  Target grams are
    computed once per distinct target list and cached."""

    def __init__(self, num_layers, weights="default", activation_shift=False):
        self.activation_shift = float(int(activation_shift))
        self.weights = _compute_weights(num_layers=num_layers,
                                        weight_type=weights,
                                        chained_gram=False)
        # id(target arrays) -> (targets kept alive, normalized grams)
        self._target_cache = {}

    def clear_target_cache(self):
        self._target_cache.clear()

    def _target_grams(self, targets):
        key = tuple(id(t) for t in targets)
        hit = self._target_cache.get(key)
        if hit is None:
            grams = tuple(normalized_gram(t, self.activation_shift) for t in targets)
            if len(self._target_cache) >= 8:          # keep the cache bounded
                self._target_cache.clear()
            # Hold the target arrays so their id() keys cannot be recycled.
            self._target_cache[key] = (tuple(targets), grams)
            hit = self._target_cache[key]
        return hit[1]

    def __call__(self, inputs, targets):
        assert len(inputs) == len(targets)
        assert len(inputs) == len(self.weights)
        target_grams = self._target_grams(targets)
        loss_list = []
        for x, a, w in zip(inputs, target_grams, self.weights):
            g = normalized_gram(x, self.activation_shift)
            loss_list.append(w * jnp.sum((g - a) ** 2))
        return jnp.sum(jnp.stack(loss_list))


# ----------------------------------------------------------------------------
# Pure-JAX references + self-test
# ----------------------------------------------------------------------------

def _reference_gram(x, shift):
    _, C, H, W = x.shape
    v = jnp.asarray(x, jnp.float32) - shift
    g = jnp.einsum("bxhw,byhw->bxy", v, v, precision=lax.Precision.HIGHEST)
    return g / (2.0 * C * H * W)


def _reference_loss(inputs, targets, weights, shift):
    total = jnp.float32(0.0)
    for inp, tgt, w in zip(inputs, targets, weights):
        G = _reference_gram(inp, shift)
        A = _reference_gram(tgt, shift)
        total = total + w * jnp.sum((G - A) ** 2)
    return total


if __name__ == "__main__":
    key = jax.random.PRNGKey(0)
    k1, k2, k3, k4, k5 = jax.random.split(key, 5)

    # Two "VGG-like" feature layers, small synthetic shapes (NCHW).
    inputs = [
        jax.random.normal(k1, (2, 4, 16, 16), jnp.float32),
        jax.random.normal(k2, (2, 8, 8, 8), jnp.float32),
    ]
    targets = [
        jax.random.normal(k3, (2, 4, 16, 16), jnp.float32),
        jax.random.normal(k4, (2, 8, 8, 8), jnp.float32),
    ]

    loss_mod = StyleLossPallas(num_layers=2, weights="improved",
                               activation_shift=True)

    loss = jax.block_until_ready(loss_mod(inputs, targets))
    # Second call hits the cached target grams (same arrays) -> only x grams run.
    loss2 = jax.block_until_ready(loss_mod(inputs, targets))

    ref = _reference_loss(inputs, targets, loss_mod.weights,
                          loss_mod.activation_shift)
    # MXU operands are cast to bf16 in-kernel, so compare at bf16 tolerance
    # against the float32 (HIGHEST precision) reference.
    assert jnp.allclose(loss, ref, rtol=5e-2, atol=1e-6), (loss, ref)
    assert jnp.allclose(loss, loss2, rtol=1e-6, atol=0.0), (loss, loss2)

    # Exercise the multi-tile / ragged-tail-mask / 2-way core-split paths with a
    # forced small lane tile: L = 8*72 = 576 -> 5 tiles of 128 (last one masked),
    # B = 1 -> contraction tiles split across two "parallel" grid entries.
    xs = jax.random.normal(k5, (1, 16, 8, 72), jnp.float32)
    g_kernel = jax.block_until_ready(
        normalized_gram(xs, activation_shift=1.0, lane_tile=128))
    g_ref = _reference_gram(xs, 1.0)
    assert jnp.allclose(g_kernel, g_ref, rtol=2e-2, atol=1e-4), (
        float(jnp.max(jnp.abs(g_kernel - g_ref))))

    print("KERNEL_OK")
</pallas_src>

<mosaic_0001>
module attributes {stable_mosaic.version = 11 : i64} {
  func.func @kernel(%arg0: i32, %arg1: i32, %arg2: i32, %arg3: memref<1x4x256xf32, #tpu.memory_space<vmem>>, %arg4: memref<1x1x4x4xf32, #tpu.memory_space<vmem>>) attributes {dimension_semantics = [#tpu.dimension_semantics<parallel>, #tpu.dimension_semantics<parallel>, #tpu.dimension_semantics<arbitrary>], iteration_bounds = array<i64: 1, 2, 1>, scalar_prefetch = 0 : i64, scratch_operands = 0 : i64, tpu.core_type = #tpu.core_type<tc>, window_params = [{transform_indices = @transform_0, window_bounds = array<i64: 1, 4, 256>}, {transform_indices = @transform_1, window_bounds = array<i64: 1, 1, 4, 4>}]} {
    %c0_i32 = arith.constant 0 : i32
    %0 = arith.cmpi eq, %arg2, %c0_i32 : i32
    %1 = arith.extui %0 : i1 to i32
    %c0_i32_0 = arith.constant 0 : i32
    %2 = arith.cmpi ne, %1, %c0_i32_0 : i32
    scf.if %2 {
      %cst_12 = arith.constant 0.000000e+00 : f32
      %15 = vector.broadcast %cst_12 : f32 to vector<1x1x4x4xf32>
      %c0_13 = arith.constant 0 : index
      %c0_14 = arith.constant 0 : index
      %c0_15 = arith.constant 0 : index
      %c0_16 = arith.constant 0 : index
      %16 = vector.load %arg4[%c0_13, %c0_14, %c0_15, %c0_16] : memref<1x1x4x4xf32, #tpu.memory_space<vmem>>, vector<1x1x4x4xf32>
      tpu.vector_store %arg4[%c0_13, %c0_14, %c0_15, %c0_16], %15 {strides = array<i32>} : memref<1x1x4x4xf32, #tpu.memory_space<vmem>>, vector<1x1x4x4xf32>,
    } else {
    }
    %c0 = arith.constant 0 : index
    %c0_1 = arith.constant 0 : index
    %c0_2 = arith.constant 0 : index
    %3 = vector.load %arg3[%c0, %c0_1, %c0_2] : memref<1x4x256xf32, #tpu.memory_space<vmem>>, vector<1x4x256xf32>
    %4 = vector.shape_cast %3 : vector<1x4x256xf32> to vector<4x256xf32>
    %cst = arith.constant 1.000000e+00 : f32
    %5 = vector.broadcast %cst : f32 to vector<4x256xf32>
    %6 = arith.subf %4, %5 : vector<4x256xf32>
    %7 = arith.truncf %6 : vector<4x256xf32> to vector<4x256xbf16>
    %cst_3 = arith.constant dense<0.000000e+00> : vector<4x4xf32>
    %8 = tpu.matmul %7, %7, %cst_3 {dimension_numbers = #tpu.dot_dimension_numbers<[1], [1], [0], [0], [0, 0, 1, 0], [], []>} : vector<4x256xbf16>, vector<4x256xbf16>, vector<4x4xf32> -> vector<4x4xf32>
    %c0_4 = arith.constant 0 : index
    %c0_5 = arith.constant 0 : index
    %c0_6 = arith.constant 0 : index
    %c0_7 = arith.constant 0 : index
    %9 = vector.load %arg4[%c0_4, %c0_5, %c0_6, %c0_7] : memref<1x1x4x4xf32, #tpu.memory_space<vmem>>, vector<1x1x4x4xf32>
    %10 = vector.shape_cast %9 : vector<1x1x4x4xf32> to vector<4x4xf32>
    %11 = arith.addf %10, %8 : vector<4x4xf32>
    %c0_8 = arith.constant 0 : index
    %c0_9 = arith.constant 0 : index
    %c0_10 = arith.constant 0 : index
    %c0_11 = arith.constant 0 : index
    %12 = vector.load %arg4[%c0_8, %c0_9, %c0_10, %c0_11] : memref<1x1x4x4xf32, #tpu.memory_space<vmem>>, vector<1x1x4x4xf32>
    %13 = vector.shape_cast %12 : vector<1x1x4x4xf32> to vector<4x4xf32>
    %14 = vector.shape_cast %11 : vector<4x4xf32> to vector<1x1x4x4xf32>
    tpu.vector_store %arg4[%c0_8, %c0_9, %c0_10, %c0_11], %14 {strides = array<i32>} : memref<1x1x4x4xf32, #tpu.memory_space<vmem>>, vector<1x1x4x4xf32>,
    return
  }
  func.func @transform_0(%arg0: i32, %arg1: i32, %arg2: i32) -> (i32, i32, i32) {
    %c1_i32 = arith.constant 1 : i32
    %0 = arith.muli %arg0, %c1_i32 : i32
    %1 = arith.addi %0, %arg2 : i32
    %c0_i32 = arith.constant 0 : i32
    %c0_i32_0 = arith.constant 0 : i32
    return %arg1, %c0_i32, %1 : i32, i32, i32
  }
  func.func @transform_1(%arg0: i32, %arg1: i32, %arg2: i32) -> (i32, i32, i32, i32) {
    %c0_i32 = arith.constant 0 : i32
    %c0_i32_0 = arith.constant 0 : i32
    %c0_i32_1 = arith.constant 0 : i32
    return %arg0, %arg1, %c0_i32, %c0_i32_0 : i32, i32, i32, i32
  }
}

</mosaic_0001>

<bundles_post_ra>
// kernel: _normalized_gram_impl.1
= control target key start
LH: loop header
LB: loop body
LE: loop exit
PB: predicated region body
PF: predicated region fallthrough
CT: control target
= control target key end

     0   :  { %6 = vsyncpa [#allocation3], 0  ;;  %s616_s0 = inlined_call_operand.hbm [shape: f32[2,4,256], index: 0, kind: input, shape index: {}]   ;;  %s617_s1 = inlined_call_operand.vmem [shape: f32[1,2,4,4], index: 1, kind: output, shape index: {}]  }
   0x1   :  { %8 = vsyncpa [#allocation3 + $0x1], 0  ;;  %s489_s6 = smov 0   ;;  %s491_s7 = smov 0  }
   0x2   :  { %s493_s8 = smov 0   ;;  %s495_s9 = smov 0  }
   0x3   :  { %s497_s10 = smov 0   ;;  %s499_s11 = smov 0  }
   0x4 LB: > { %s325_s12 = sadd.s32 4294967295, %s475_s11   ;;  %s29_s13 = sadd.s32 1, %s471_s10  ;;  %s475_s11 = sphi %s499_s11, %s14_s11   ;;  %s471_s10 = sphi %s497_s10, %s627_s10   ;;  %s467_s9 = sphi %s495_s9, %s626_s9   ;;  %s463_s8 = sphi %s493_s8, %s625_s8   ;;  %s459_s7 = sphi %s491_s7, %s624_s7   ;;  %s455_s6 = sphi %s489_s6, %s623_s6  }
   0x5   : > { %p31_p0 = scmp.ge.s32.totalorder %s29_s13, 2  ;;  %s44_s14 = sadd.s32 1, %s463_s8 }
   0x6   : > { %p51_p1 = scmp.ne.s32.totalorder %s463_s8, %s459_s7  ;;  %p52_p2 = scmp.eq.s32.totalorder %s475_s11, 0 }
   0x7   : > { %s629_s13 = smov (%p31_p0, %s29_s13), 0  ;;  %p57_p4 = scmp.ne.s32.totalorder %s459_s7, %s455_s6 }
   0x8   : > { %p525_p3 = por %p52_p2, %p51_p1  ;;  %s39_s16 = ssub.s32 %s471_s10, %s629_s13 }
   0x9   : > { %p58_p5 = scmp.eq.s32.totalorder %s325_s12, 0  ;;  %p42_p6 = scmp.eq.s32.totalorder %s39_s16, 0 }
   0xa   : > { %p345_p8 = scmp.lt.s32.totalorder %s475_s11, 2  ;;  %s109_s19 = sand.u32 1, %s463_s8  }
   0xb   : > { %p532_p7 = por %p58_p5, %p57_p4  ;;  %s338_s20 = sshll.u32 %s471_s10, 7 }
   0xc   : > { %s538_s18 = scalar_select %p42_p6, %s463_s8, %s44_s14  }
   0xd   : > { %s329_s21 = sshll.u32 %s109_s19, 3  ;;  %s545_s24 = scalar_lea.hbm %s616_s0, %s338_s20 }
   0xe   : > { %s113_s25 = scalar_lea.vmem [#allocation2], %s329_s21  ;;  %p549_p9 = pnand %p345_p8, %p525_p3 }
   0xf   : > { %s124_s26 = sshll.u32 %s113_s25, 4  ;;  %s110_s28 = scalar_lea.sflag [#allocation3], %s109_s19  ;;  %s553_s26 = int_to_ptr.vmem [resolvable:$true] %s124_s26 }
  0x10   : > { %s395_s29 = scalar_lea.hbm %s545_s24, 128  ;;  %p397_p13 = pneg %p549_p9 }
  0x11   : > { %p396_p12 = scmp.ne.s32.totalorder %s545_s24, %s395_s29  ;;  %s400_s3 = scalar_lea.hbm %s616_s0, 256 }
  0x12   : > { %p401_p2 = scmp.lt.u32.totalorder %s545_s24, %s616_s0  ;;  %p402_p3 = scmp.lt.u32.totalorder %s400_s3, %s395_s29 }
  0x13   : > { %p398_p0 = pnand %p397_p13, %p396_p12  ;;  %p404_p5 = scmp.lt.u32.totalorder %s395_s29, %s545_s24 }
  0x14   : > { %p403_p4 = por %p402_p3, %p401_p2 }
  0x15   : > { %p399_p1 = pneg %p398_p0 }
  0x16   : > { %p405_p6 = por %p404_p5, %p403_p4 }
  0x18   : > { %p406_p8 = pnand %p405_p6, %p399_p1 }
  0x1a   : > { %409 = shalt.err (!%p406_p8)
}
  0x1b   : > { %s410_s6 = scalar_lea.vmem %s553_s26, 128  ;;  %s477_s12 = smov [#allocation2]  }
  0x1c   : > { %p411_p12 = scmp.ne.s32.totalorder %s553_s26, %s410_s6  ;;  %s415_s14 = sshll.u32 %s477_s12, 4  ;;  %s416_s14 = int_to_ptr.vmem [resolvable:$false] %s415_s14 }
  0x1d   : > { %s417_s15 = scalar_lea.vmem %s416_s14, 256  ;;  %p418_p11 = scmp.lt.s32.totalorder %s553_s26, %s416_s14 }
  0x1e   : > { %p413_p0 = pnand %p411_p12, %p397_p13  ;;  %p419_p2 = scmp.lt.s32.totalorder %s417_s15, %s410_s6 }
  0x20   : > { %p414_p10 = pneg %p413_p0  ;;  %p420_p3 = por %p419_p2, %p418_p11 }
  0x22   : > { %p421_p4 = pnand %p420_p3, %p414_p10 }
  0x24   : > { %424 = shalt.err (!%p421_p4)
}
  0x25   : > { %344 = dma.hbm_to_vmem [thread:$0]  (!%p549_p9), %s545_s24, 128, %s553_s26, %s110_s28  }
  0x26   : > { %p621_p1 = scmp.lt.s32.totalorder %s475_s11, 3  ;;  %p622_p5 = scmp.ge.s32.totalorder %s475_s11, 1 }
  0x28   : > { %p130_p13 = pnand %p622_p5, %p621_p1 }
  0x29   : > { %s135_s16 = sand.u32 (!%p130_p13), 1, %s459_s7  }
  0x2a   : > { %133 = sbr.rel (%p130_p13) target bundleno = 280 (0x118), region = 24  ;;  %s333_s19 = sshll.u32 (!%p130_p13), %s135_s16, 3 }
  0x2b   : > { %s136_s20 = scalar_lea.sflag (!%p130_p13), [#allocation3], %s135_s16  ;;  %s139_s21 = scalar_lea.vmem (!%p130_p13), [#allocation2], %s333_s19 }
  0x31   : > { %450 = dma.done.wait (%p532_p7), %s136_s20, 128  }
  0x32   : > { %452 = vsyncadd (%p532_p7), %s136_s20, 4294967168  ;;  %p165_p10 = scmp.lt.s32.totalorder %s467_s9, 1  ;;  %vm176_vm0 = vcmask 27648   ;;  %v478_v0 = vmov 0.0   ;;  %v178_v1 = vld [vmem:[%s139_s21] sm:$0xff] }
  0x33   : > { %v335_v2 = vadd.f32 -1.0, %v178_v1 }
  0x34   : > { %s631_s9 = smov (!%p165_p10, %s467_s9), 1 }
  0x35   : > { %s334_s22 = sshll.u32 %s631_s9, 2  ;;  %v181_v3 = vcombine.high %v335_v2, %v335_v2  ;;  %v183_v4 = vpack.c.bf16 %v335_v2, %v335_v2 }
  0x36   : > { %s170_s25 = scalar_lea.vmem %s617_s1, %s334_s22 }
  0x37   : > { %177 = vst.msk [vmem:[%s170_s25] sm:$0xf] %vm176_vm0, %v478_v0  ;;  %v184_v5 = vpack.c.bf16 %v181_v3, %v181_v3 }
  0x39   : > { %185 = vmatprep.subr.bf16.mxu0 %v184_v5  ;;  %217 = vmatprep.mubr.bf16.mxu0 %v184_v5 }
  0x3a   : > { %186 = vmatpush1.bf16.xpose.msra.mxu0 %v183_v4 }
  0x3e   : > { %v225_v6 = vld [vmem:[%s170_s25] sm:$0xf] }
  0x41   : > { %218 = vmatmul.mubr.bf16.vlgmr.msra.gmra.mrb[0].mxu0 %v183_v4 }
 0x114   : > { %v219_v7 = vpop.f32.mrb[0].mxu0 }
 0x115   : > { %v226_v8 = vadd.f32 %v225_v6, %v219_v7  ;;  %v221_v9 = vpop.f32.mrb[1].mxu0 }
 0x116   : > { %v222_v10 = vpop.f32.mrb[2].mxu0 }
 0x117   : > { %228 = vst.msk [vmem:[%s170_s25] sm:$0xf] %vm176_vm0, %v226_v8  ;;  %v223_v11 = vpop.f32.mrb[3].mxu0 }
 0x118 PF: > { %s14_s11 = sadd.s32 1, %s475_s11   ;;  %s623_s6 = smov %s459_s7 }
 0x119   : > { %p11_p7 = scmp.ge.s32.totalorder %s14_s11, 4   ;;  %s624_s7 = smov %s463_s8 }
 0x11a   : > { %s625_s8 = smov %s538_s18  ;;  %s626_s9 = smov %s471_s10 }
 0x11b   : > { %s627_s10 = smov %s629_s13  ;;  %13 = sbr.rel (!%p11_p7) target bundleno = 4 (0x4), region = 68 }
 0x122   :  { %256 = vsyncpa [#allocation3], 1 }
 0x123   :  { %258 = vsyncpa [#allocation3 + $0x1], 1 }

</bundles_post_ra>
